<compile_context>
chip_gen: v5e
topology: v5e:2x2
jax: 0.10.0
libtpu: 0.0.40
codegen_flags: <defaults>
</compile_context>

<pallas_src>
import jax
import jax.numpy as jnp
from jax.experimental import pallas as pl
from jax.experimental.pallas import tpu as pltpu


def _round_up(n: int, m: int) -> int:
    return ((n + m - 1) // m) * m


def _cdiv(a: int, b: int) -> int:
    return -(-a // b)


def _vmem_budget_bytes() -> int:
    """Per-generation VMEM budget with headroom for Mosaic internal scratch."""
    try:
        cap = int(pltpu.get_tpu_info().vmem_capacity_bytes)
    except Exception:
        cap = 64 * 1024 * 1024  # conservative fallback (v7x per-TC VMEM)
    # Never request 100% of physical VMEM: keep 1/8 for pipeline bookkeeping.
    # -> ~56 MiB on v7x (64 MiB parts), ~112 MiB on v5e/v6e (128 MiB parts).
    return (cap * 7) // 8


def weightnet_kernel(x_ref, w1_ref, b1_ref, w2_ref, b2_ref, w3_ref, b3_ref,
                     w4_ref, b4_ref, out_ref):
    """One (tb, in_pad) row-block of the batch through the full MLP."""
    cdt = w1_ref.dtype  # MXU operand dtype (f32 or bf16); accumulation is f32.

    # fc1 + relu
    h = jnp.dot(x_ref[...], w1_ref[...],
                preferred_element_type=jnp.float32) + b1_ref[...]
    h = jnp.maximum(h, 0.0)
    # fc2 + relu
    h = jnp.dot(h.astype(cdt), w2_ref[...],
                preferred_element_type=jnp.float32) + b2_ref[...]
    h = jnp.maximum(h, 0.0)
    # fc3 + relu
    h = jnp.dot(h.astype(cdt), w3_ref[...],
                preferred_element_type=jnp.float32) + b3_ref[...]
    h = jnp.maximum(h, 0.0)
    # fc4 logits. Padded output columns have zero w4 columns and a -1e30 bias,
    # so the softmax mask is encoded in the padding (no iota/where needed).
    logits = jnp.dot(h.astype(cdt), w4_ref[...],
                     preferred_element_type=jnp.float32) + b4_ref[...]

    # Softmax over dim=1 on the padded lane width; padded cols -> exp(.) == 0.
    m = jnp.max(logits, axis=1, keepdims=True)
    ex = jnp.exp(logits - m)
    denom = jnp.sum(ex, axis=1, keepdims=True)
    out_ref[...] = ex * pl.reciprocal(denom, approx=False)


def weightnet_forward(x, params, *, block_b: int = 512,
                      compute_dtype=jnp.float32):
    """Pallas forward pass equivalent to WeightNet.forward(x)."""
    B, in_dim = x.shape
    hid_dim = params["w1"].shape[1]
    out_dim = params["w4"].shape[1]

    # Lane-dense padded feature dims (multiple of 128).
    in_p = _round_up(in_dim, 128)
    hid_p = _round_up(hid_dim, 128)
    out_p = _round_up(out_dim, 128)

    vmem_budget = _vmem_budget_bytes()

    def _weight_bytes(itemsize):
        # Weights in compute dtype, biases always f32.
        return (itemsize * (in_p * hid_p + hid_p * hid_p + hid_p * in_p + in_p * out_p)
                + 4 * (2 * hid_p + in_p + out_p))

    compute_dtype = jnp.dtype(compute_dtype)
    if compute_dtype == jnp.dtype(jnp.float32) and _weight_bytes(4) > vmem_budget // 2:
        # Sizing guard (v7x 64 MiB): resident f32 weights would eat > 1/2 VMEM,
        # so fall back to bf16 MXU operands (f32 accumulation).
        compute_dtype = jnp.dtype(jnp.bfloat16)
    weight_bytes = _weight_bytes(compute_dtype.itemsize)
    # TODO(synk): if even bf16 resident weights exceed ~1/2 VMEM (very large
    # hidden_dim), tile the contraction with an extra "arbitrary" K grid axis
    # and a VMEM f32 accumulator instead of keeping all weights resident.

    # Batch tile: as big as the VMEM budget allows (x/out are double-buffered,
    # activations live in f32), capped at block_b, sublane-aligned to 8, and
    # capped to <= ceil(B/2) for B >= 16 so both TensorCores get row blocks.
    per_row_stream = 2 * compute_dtype.itemsize * in_p + 2 * 4 * out_p
    per_row_compute = 4 * (2 * hid_p + in_p + out_p)
    avail = max(vmem_budget - weight_bytes - (4 << 20), 8 * (per_row_stream + per_row_compute))
    tb_vmem = avail // (per_row_stream + per_row_compute)
    tb = max(8, (min(block_b, tb_vmem) // 8) * 8)
    if B >= 16:
        tb = min(tb, _round_up(_cdiv(B, 2), 8))
    else:
        tb = _round_up(max(B, 1), 8)
    B_p = _round_up(B, tb)

    def pad2(a, rows, cols, dtype, fill=0.0):
        a = jnp.asarray(a, dtype)
        return jnp.pad(a, ((0, rows - a.shape[0]), (0, cols - a.shape[1])),
                       constant_values=fill)

    xp = pad2(x, B_p, in_p, compute_dtype)
    w1 = pad2(params["w1"], in_p, hid_p, compute_dtype)
    b1 = pad2(params["b1"].reshape(1, -1), 1, hid_p, jnp.float32)
    w2 = pad2(params["w2"], hid_p, hid_p, compute_dtype)
    b2 = pad2(params["b2"].reshape(1, -1), 1, hid_p, jnp.float32)
    w3 = pad2(params["w3"], hid_p, in_p, compute_dtype)
    b3 = pad2(params["b3"].reshape(1, -1), 1, in_p, jnp.float32)
    w4 = pad2(params["w4"], in_p, out_p, compute_dtype)
    # Padded output columns get a -1e30 bias -> softmax mask for free.
    b4 = pad2(params["b4"].reshape(1, -1), 1, out_p, jnp.float32, fill=-1e30)

    grid = (B_p // tb,)

    # Resident operands: constant block index, so single-buffer them.
    resident = dict(pipeline_mode=pl.Buffered(1))
    in_specs = [
        # x row block: streamed, default double-buffering.
        # (If a profile shows exposed input DMA for very large in_dim, bump
        #  this one to pipeline_mode=pl.Buffered(3).)
        pl.BlockSpec((tb, in_p), lambda i: (i, 0)),
        pl.BlockSpec((in_p, hid_p), lambda i: (0, 0), **resident),   # w1
        pl.BlockSpec((1, hid_p), lambda i: (0, 0), **resident),      # b1
        pl.BlockSpec((hid_p, hid_p), lambda i: (0, 0), **resident),  # w2
        pl.BlockSpec((1, hid_p), lambda i: (0, 0), **resident),      # b2
        pl.BlockSpec((hid_p, in_p), lambda i: (0, 0), **resident),   # w3
        pl.BlockSpec((1, in_p), lambda i: (0, 0), **resident),       # b3
        pl.BlockSpec((in_p, out_p), lambda i: (0, 0), **resident),   # w4
        pl.BlockSpec((1, out_p), lambda i: (0, 0), **resident),      # b4
    ]

    flops = 2 * B_p * (in_p * hid_p + hid_p * hid_p + hid_p * in_p + in_p * out_p)
    bytes_accessed = (
        compute_dtype.itemsize * (xp.size + w1.size + w2.size + w3.size + w4.size)
        + 4 * (b1.size + b2.size + b3.size + b4.size + B_p * out_p))

    out_padded = pl.pallas_call(
        weightnet_kernel,
        out_shape=jax.ShapeDtypeStruct((B_p, out_p), jnp.float32),
        grid_spec=pltpu.PrefetchScalarGridSpec(
            num_scalar_prefetch=0,
            grid=grid,
            in_specs=in_specs,
            out_specs=pl.BlockSpec((tb, out_p), lambda i: (i, 0)),
        ),
        compiler_params=pltpu.CompilerParams(
            dimension_semantics=("parallel",),   # megacore-split row blocks
            vmem_limit_bytes=int(vmem_budget),
        ),
        cost_estimate=pl.CostEstimate(
            flops=flops,
            transcendentals=B_p * out_p,
            bytes_accessed=bytes_accessed,
        ),
    )(xp, w1, b1, w2, b2, w3, b3, w4, b4)

    return out_padded[:B, :out_dim]


def make_params(key, input_dim, hidden_dim, output_dim):
    """Weights stored as (in, out) so forward is x @ W + b (same math as nn.Linear)."""
    ks = jax.random.split(key, 8)
    scale = 0.1
    return {
        "w1": scale * jax.random.normal(ks[0], (input_dim, hidden_dim), jnp.float32),
        "b1": scale * jax.random.normal(ks[1], (hidden_dim,), jnp.float32),
        "w2": scale * jax.random.normal(ks[2], (hidden_dim, hidden_dim), jnp.float32),
        "b2": scale * jax.random.normal(ks[3], (hidden_dim,), jnp.float32),
        "w3": scale * jax.random.normal(ks[4], (hidden_dim, input_dim), jnp.float32),
        "b3": scale * jax.random.normal(ks[5], (input_dim,), jnp.float32),
        "w4": scale * jax.random.normal(ks[6], (input_dim, output_dim), jnp.float32),
        "b4": scale * jax.random.normal(ks[7], (output_dim,), jnp.float32),
    }


if __name__ == "__main__":
    key = jax.random.PRNGKey(0)

    # Small shapes consistent with the module.
    B = 8
    input_dim = 16
    hidden_dim = 32
    output_dim = 4

    k_x, k_p = jax.random.split(key)
    x = jax.random.normal(k_x, (B, input_dim), jnp.float32)
    params = make_params(k_p, input_dim, hidden_dim, output_dim)

    # Pure-JAX reference.
    def ref_forward(x, p):
        h = jax.nn.relu(x @ p["w1"] + p["b1"])
        h = jax.nn.relu(h @ p["w2"] + p["b2"])
        h = jax.nn.relu(h @ p["w3"] + p["b3"])
        return jax.nn.softmax(h @ p["w4"] + p["b4"], axis=1)

    ref = ref_forward(x, params)

    # Default (f32 MXU operands): exact vs. the f32 reference.
    out = weightnet_forward(x, params)
    jax.block_until_ready(out)
    assert out.shape == (B, output_dim)
    assert jnp.allclose(out, ref, atol=1e-4), float(jnp.max(jnp.abs(out - ref)))
    assert jnp.allclose(jnp.sum(out, axis=1), 1.0, atol=1e-4)

    # bf16 MXU-operand path (perf-review option: ~3x MXU throughput, half the
    # x DMA bytes); checked with an appropriately looser tolerance.
    out_bf16 = weightnet_forward(x, params, compute_dtype=jnp.bfloat16)
    jax.block_until_ready(out_bf16)
    assert out_bf16.shape == (B, output_dim)
    assert jnp.allclose(out_bf16, ref, atol=5e-2), float(jnp.max(jnp.abs(out_bf16 - ref)))
    assert jnp.allclose(jnp.sum(out_bf16, axis=1), 1.0, atol=1e-3)

    # TODO(synk): l2_regularization() is a training-time helper over parameters,
    # not part of forward(); it is not implemented as a kernel.

    print("KERNEL_OK")
</pallas_src>

<mosaic_0001>
module attributes {stable_mosaic.version = 11 : i64} {
  func.func @weightnet_kernel(%arg0: i32, %arg1: memref<8x128xf32, #tpu.memory_space<vmem>>, %arg2: memref<128x128xf32, #tpu.memory_space<vmem>>, %arg3: memref<1x128xf32, #tpu.memory_space<vmem>>, %arg4: memref<128x128xf32, #tpu.memory_space<vmem>>, %arg5: memref<1x128xf32, #tpu.memory_space<vmem>>, %arg6: memref<128x128xf32, #tpu.memory_space<vmem>>, %arg7: memref<1x128xf32, #tpu.memory_space<vmem>>, %arg8: memref<128x128xf32, #tpu.memory_space<vmem>>, %arg9: memref<1x128xf32, #tpu.memory_space<vmem>>, %arg10: memref<8x128xf32, #tpu.memory_space<vmem>>) attributes {dimension_semantics = [#tpu.dimension_semantics<parallel>], iteration_bounds = array<i64: 1>, scalar_prefetch = 0 : i64, scratch_operands = 0 : i64, tpu.core_type = #tpu.core_type<tc>, window_params = [{transform_indices = @transform_0, window_bounds = array<i64: 8, 128>}, {pipeline_mode = #tpu.pipeline_mode<synchronous>, transform_indices = @transform_1, window_bounds = array<i64: 128, 128>}, {pipeline_mode = #tpu.pipeline_mode<synchronous>, transform_indices = @transform_2, window_bounds = array<i64: 1, 128>}, {pipeline_mode = #tpu.pipeline_mode<synchronous>, transform_indices = @transform_3, window_bounds = array<i64: 128, 128>}, {pipeline_mode = #tpu.pipeline_mode<synchronous>, transform_indices = @transform_4, window_bounds = array<i64: 1, 128>}, {pipeline_mode = #tpu.pipeline_mode<synchronous>, transform_indices = @transform_5, window_bounds = array<i64: 128, 128>}, {pipeline_mode = #tpu.pipeline_mode<synchronous>, transform_indices = @transform_6, window_bounds = array<i64: 1, 128>}, {pipeline_mode = #tpu.pipeline_mode<synchronous>, transform_indices = @transform_7, window_bounds = array<i64: 128, 128>}, {pipeline_mode = #tpu.pipeline_mode<synchronous>, transform_indices = @transform_8, window_bounds = array<i64: 1, 128>}, {transform_indices = @transform_9, window_bounds = array<i64: 8, 128>}]} {
    %c0 = arith.constant 0 : index
    %c0_0 = arith.constant 0 : index
    %0 = vector.load %arg1[%c0, %c0_0] : memref<8x128xf32, #tpu.memory_space<vmem>>, vector<8x128xf32>
    %c0_1 = arith.constant 0 : index
    %c0_2 = arith.constant 0 : index
    %1 = vector.load %arg2[%c0_1, %c0_2] : memref<128x128xf32, #tpu.memory_space<vmem>>, vector<128x128xf32>
    %cst = arith.constant dense<0.000000e+00> : vector<8x128xf32>
    %2 = tpu.matmul %0, %1, %cst {dimension_numbers = #tpu.dot_dimension_numbers<[1], [0], [0], [1], [0, 0, 1, 1], [], []>} : vector<8x128xf32>, vector<128x128xf32>, vector<8x128xf32> -> vector<8x128xf32>
    %c0_3 = arith.constant 0 : index
    %c0_4 = arith.constant 0 : index
    %3 = vector.load %arg3[%c0_3, %c0_4] : memref<1x128xf32, #tpu.memory_space<vmem>>, vector<1x128xf32>
    %4 = vector.broadcast %3 : vector<1x128xf32> to vector<8x128xf32>
    %5 = arith.addf %2, %4 : vector<8x128xf32>
    %cst_5 = arith.constant 0.000000e+00 : f32
    %6 = vector.broadcast %cst_5 : f32 to vector<8x128xf32>
    %7 = arith.maximumf %5, %6 : vector<8x128xf32>
    %c0_6 = arith.constant 0 : index
    %c0_7 = arith.constant 0 : index
    %8 = vector.load %arg4[%c0_6, %c0_7] : memref<128x128xf32, #tpu.memory_space<vmem>>, vector<128x128xf32>
    %cst_8 = arith.constant dense<0.000000e+00> : vector<8x128xf32>
    %9 = tpu.matmul %7, %8, %cst_8 {dimension_numbers = #tpu.dot_dimension_numbers<[1], [0], [0], [1], [0, 0, 1, 1], [], []>} : vector<8x128xf32>, vector<128x128xf32>, vector<8x128xf32> -> vector<8x128xf32>
    %c0_9 = arith.constant 0 : index
    %c0_10 = arith.constant 0 : index
    %10 = vector.load %arg5[%c0_9, %c0_10] : memref<1x128xf32, #tpu.memory_space<vmem>>, vector<1x128xf32>
    %11 = vector.broadcast %10 : vector<1x128xf32> to vector<8x128xf32>
    %12 = arith.addf %9, %11 : vector<8x128xf32>
    %cst_11 = arith.constant 0.000000e+00 : f32
    %13 = vector.broadcast %cst_11 : f32 to vector<8x128xf32>
    %14 = arith.maximumf %12, %13 : vector<8x128xf32>
    %c0_12 = arith.constant 0 : index
    %c0_13 = arith.constant 0 : index
    %15 = vector.load %arg6[%c0_12, %c0_13] : memref<128x128xf32, #tpu.memory_space<vmem>>, vector<128x128xf32>
    %cst_14 = arith.constant dense<0.000000e+00> : vector<8x128xf32>
    %16 = tpu.matmul %14, %15, %cst_14 {dimension_numbers = #tpu.dot_dimension_numbers<[1], [0], [0], [1], [0, 0, 1, 1], [], []>} : vector<8x128xf32>, vector<128x128xf32>, vector<8x128xf32> -> vector<8x128xf32>
    %c0_15 = arith.constant 0 : index
    %c0_16 = arith.constant 0 : index
    %17 = vector.load %arg7[%c0_15, %c0_16] : memref<1x128xf32, #tpu.memory_space<vmem>>, vector<1x128xf32>
    %18 = vector.broadcast %17 : vector<1x128xf32> to vector<8x128xf32>
    %19 = arith.addf %16, %18 : vector<8x128xf32>
    %cst_17 = arith.constant 0.000000e+00 : f32
    %20 = vector.broadcast %cst_17 : f32 to vector<8x128xf32>
    %21 = arith.maximumf %19, %20 : vector<8x128xf32>
    %c0_18 = arith.constant 0 : index
    %c0_19 = arith.constant 0 : index
    %22 = vector.load %arg8[%c0_18, %c0_19] : memref<128x128xf32, #tpu.memory_space<vmem>>, vector<128x128xf32>
    %cst_20 = arith.constant dense<0.000000e+00> : vector<8x128xf32>
    %23 = tpu.matmul %21, %22, %cst_20 {dimension_numbers = #tpu.dot_dimension_numbers<[1], [0], [0], [1], [0, 0, 1, 1], [], []>} : vector<8x128xf32>, vector<128x128xf32>, vector<8x128xf32> -> vector<8x128xf32>
    %c0_21 = arith.constant 0 : index
    %c0_22 = arith.constant 0 : index
    %24 = vector.load %arg9[%c0_21, %c0_22] : memref<1x128xf32, #tpu.memory_space<vmem>>, vector<1x128xf32>
    %25 = vector.broadcast %24 : vector<1x128xf32> to vector<8x128xf32>
    %26 = arith.addf %23, %25 : vector<8x128xf32>
    %cst_23 = arith.constant dense<0xFF800000> : vector<8xf32>
    %27 = vector.multi_reduction <maximumf>, %26, %cst_23 [1] : vector<8x128xf32> to vector<8xf32>
    %28 = vector.shape_cast %27 : vector<8xf32> to vector<8x1xf32>
    %29 = vector.broadcast %28 : vector<8x1xf32> to vector<8x128xf32>
    %30 = arith.subf %26, %29 : vector<8x128xf32>
    %31 = math.exp %30 : vector<8x128xf32>
    %cst_24 = arith.constant dense<0.000000e+00> : vector<8xf32>
    %32 = vector.multi_reduction <add>, %31, %cst_24 [1] : vector<8x128xf32> to vector<8xf32>
    %33 = vector.shape_cast %32 : vector<8xf32> to vector<8x1xf32>
    %34 = tpu.reciprocal %33 : vector<8x1xf32> -> vector<8x1xf32>
    %35 = vector.broadcast %34 : vector<8x1xf32> to vector<8x128xf32>
    %36 = arith.mulf %31, %35 : vector<8x128xf32>
    %c0_25 = arith.constant 0 : index
    %c0_26 = arith.constant 0 : index
    %37 = vector.load %arg10[%c0_25, %c0_26] : memref<8x128xf32, #tpu.memory_space<vmem>>, vector<8x128xf32>
    tpu.vector_store %arg10[%c0_25, %c0_26], %36 {strides = array<i32>} : memref<8x128xf32, #tpu.memory_space<vmem>>, vector<8x128xf32>,
    return
  }
  func.func @transform_0(%arg0: i32) -> (i32, i32) {
    %c0_i32 = arith.constant 0 : i32
    %c0_i32_0 = arith.constant 0 : i32
    return %arg0, %c0_i32 : i32, i32
  }
  func.func @transform_1(%arg0: i32) -> (i32, i32) {
    %c0_i32 = arith.constant 0 : i32
    %c0_i32_0 = arith.constant 0 : i32
    %c0_i32_1 = arith.constant 0 : i32
    return %c0_i32, %c0_i32_0 : i32, i32
  }
  func.func @transform_2(%arg0: i32) -> (i32, i32) {
    %c0_i32 = arith.constant 0 : i32
    %c0_i32_0 = arith.constant 0 : i32
    %c0_i32_1 = arith.constant 0 : i32
    return %c0_i32, %c0_i32_0 : i32, i32
  }
  func.func @transform_3(%arg0: i32) -> (i32, i32) {
    %c0_i32 = arith.constant 0 : i32
    %c0_i32_0 = arith.constant 0 : i32
    %c0_i32_1 = arith.constant 0 : i32
    return %c0_i32, %c0_i32_0 : i32, i32
  }
  func.func @transform_4(%arg0: i32) -> (i32, i32) {
    %c0_i32 = arith.constant 0 : i32
    %c0_i32_0 = arith.constant 0 : i32
    %c0_i32_1 = arith.constant 0 : i32
    return %c0_i32, %c0_i32_0 : i32, i32
  }
  func.func @transform_5(%arg0: i32) -> (i32, i32) {
    %c0_i32 = arith.constant 0 : i32
    %c0_i32_0 = arith.constant 0 : i32
    %c0_i32_1 = arith.constant 0 : i32
    return %c0_i32, %c0_i32_0 : i32, i32
  }
  func.func @transform_6(%arg0: i32) -> (i32, i32) {
    %c0_i32 = arith.constant 0 : i32
    %c0_i32_0 = arith.constant 0 : i32
    %c0_i32_1 = arith.constant 0 : i32
    return %c0_i32, %c0_i32_0 : i32, i32
  }
  func.func @transform_7(%arg0: i32) -> (i32, i32) {
    %c0_i32 = arith.constant 0 : i32
    %c0_i32_0 = arith.constant 0 : i32
    %c0_i32_1 = arith.constant 0 : i32
    return %c0_i32, %c0_i32_0 : i32, i32
  }
  func.func @transform_8(%arg0: i32) -> (i32, i32) {
    %c0_i32 = arith.constant 0 : i32
    %c0_i32_0 = arith.constant 0 : i32
    %c0_i32_1 = arith.constant 0 : i32
    return %c0_i32, %c0_i32_0 : i32, i32
  }
  func.func @transform_9(%arg0: i32) -> (i32, i32) {
    %c0_i32 = arith.constant 0 : i32
    %c0_i32_0 = arith.constant 0 : i32
    return %arg0, %c0_i32 : i32, i32
  }
}

</mosaic_0001>

<bundles_post_ra>
// kernel: tpu_custom_call.1
= control target key start
LH: loop header
LB: loop body
LE: loop exit
PB: predicated region body
PF: predicated region fallthrough
CT: control target
= control target key end

     0   :  { %14 = vsyncpa [#allocation3], 0  ;;  %s571_s0 = inlined_call_operand.hbm [shape: f32[8,128], index: 0, kind: input, shape index: {}]   ;;  %s572_s1 = inlined_call_operand.hbm [shape: f32[128,128], index: 1, kind: input, shape index: {}]   ;;  %s573_s2 = inlined_call_operand.vmem [shape: f32[1,128], index: 2, kind: input, shape index: {}]   ;;  %s574_s3 = inlined_call_operand.hbm [shape: f32[128,128], index: 3, kind: input, shape index: {}]   ;;  %s575_s4 = inlined_call_operand.vmem [shape: f32[1,128], index: 4, kind: input, shape index: {}]   ;;  %s576_s5 = inlined_call_operand.hbm [shape: f32[128,128], index: 5, kind: input, shape index: {}]   ;;  %s577_s6 = inlined_call_operand.vmem [shape: f32[1,128], index: 6, kind: input, shape index: {}]   ;;  %s578_s7 = inlined_call_operand.hbm [shape: f32[128,128], index: 7, kind: input, shape index: {}]   ;;  %s579_s8 = inlined_call_operand.vmem [shape: f32[1,128], index: 8, kind: input, shape index: {}]   ;;  %s580_s9 = inlined_call_operand.hbm [shape: f32[8,128], index: 9, kind: output, shape index: {}]  }
   0x1   :  { %15 = vsyncpa [#allocation6], 0 }
   0x2   :  { %16 = vsyncpa [#allocation9], 0  ;;  %s33_s11 = sshll.u32 %s572_s1, 4  ;;  %s34_s11 = int_to_ptr.hbm [resolvable:$true] %s33_s11 }
   0x3   :  { %17 = vsyncpa [#allocation4], 0  ;;  %s483_s12 = smov [#allocation5]   ;;  %s63_s16 = sshll.u32 %s576_s5, 4  ;;  %s64_s16 = int_to_ptr.hbm [resolvable:$true] %s63_s16 }
   0x4   :  { %s35_s13 = sshll.u32 %s483_s12, 4  ;;  %s484_s17 = smov 128   ;;  %s36_s13 = int_to_ptr.vmem [resolvable:$true] %s35_s13 }
   0x5   :  { %s485_s18 = smov 8   ;;  %s486_s19 = smov [#allocation8]  }
   0x6   :  { %41 = dma.hbm_to_vmem [thread:$0]  %s34_s11, 2048, %s36_s13, [#allocation6], %s484_s17, %s484_s17, %s485_s18  }
   0x7   :  { %s65_s20 = sshll.u32 %s486_s19, 4  ;;  %s23_s23 = sshll.u32 %s571_s0, 4  ;;  %s66_s20 = int_to_ptr.vmem [resolvable:$true] %s65_s20  ;;  %s24_s23 = int_to_ptr.hbm [resolvable:$true] %s23_s23 }
   0x8   :  { %71 = dma.hbm_to_vmem [thread:$0]  %s64_s16, 2048, %s66_s20, [#allocation9], %s484_s17, %s484_s17, %s485_s18  }
   0x9   :  { %s48_s25 = sshll.u32 %s574_s3, 4  ;;  %s487_s26 = smov [#allocation2]   ;;  %s49_s25 = int_to_ptr.hbm [resolvable:$true] %s48_s25 }
   0xa   :  { %s25_s27 = sshll.u32 %s487_s26, 4  ;;  %s488_s5 = smov [#allocation7]   ;;  %s26_s27 = int_to_ptr.vmem [resolvable:$true] %s25_s27 }
   0xb   :  { %28 = dma.hbm_to_vmem [thread:$0]  %s24_s23, 128, %s26_s27, [#allocation3]  }
   0xc   :  { %s50_s28 = sshll.u32 %s488_s5, 4  ;;  %s78_s10 = sshll.u32 %s578_s7, 4  ;;  %s51_s28 = int_to_ptr.vmem [resolvable:$true] %s50_s28  ;;  %s79_s10 = int_to_ptr.hbm [resolvable:$true] %s78_s10 }
   0xd   :  { %56 = dma.hbm_to_vmem [thread:$0]  %s49_s25, 2048, %s51_s28, [#allocation6], %s484_s17, %s484_s17, %s485_s18  }
   0xe   :  { %s489_s0 = smov [#allocation10]  }
   0xf   :  { %s80_s11 = sshll.u32 %s489_s0, 4  ;;  %s81_s11 = int_to_ptr.vmem [resolvable:$true] %s80_s11 }
  0x10   :  { %86 = dma.hbm_to_vmem [thread:$0]  %s79_s10, 2048, %s81_s11, [#allocation9], %s484_s17, %s484_s17, %s485_s18  }
  0x11   :  { %475 = dma.done.wait [#allocation3], 128  }
  0x12   :  { %476 = vsyncadd [#allocation3], 4294967168 }
  0x13   :  { %477 = dma.done.wait [#allocation6], 4096  }
  0x14   :  { %478 = vsyncadd [#allocation6], 4294963200 }
  0x15   :  { %479 = dma.done.wait [#allocation9], 4096  }
  0x16   :  { %480 = vsyncadd [#allocation9], 4294963200  ;;  %v125_v0 = vld [vmem:[#allocation5 + $0x78] sm:$0xff]  ;;  %v124_v1 = vld [vmem:[#allocation5 + $0x70] sm:$0xff]  ;;  %s303_s18 = sshll.u32 %s580_s9, 4  ;;  %s304_s18 = int_to_ptr.hbm [resolvable:$true] %s303_s18 }
  0x17   :  { %130 = vmatpush.msra.mxu0 %v125_v0  ;;  %v123_v2 = vld [vmem:[#allocation5 + $0x68] sm:$0xff]  ;;  %v122_v3 = vld [vmem:[#allocation5 + $0x60] sm:$0xff]  ;;  %v166_v4 = vld [vmem:[#allocation7 + $0x78] sm:$0xff] }
  0x18   :  { %v121_v5 = vld [vmem:[#allocation5 + $0x58] sm:$0xff]  ;;  %171 = vmatpush.msra.mxu1 %v166_v4  ;;  %v165_v6 = vld [vmem:[#allocation7 + $0x70] sm:$0xff]  ;;  %v164_v7 = vld [vmem:[#allocation7 + $0x68] sm:$0xff] }
  0x19   :  { %131 = vmatpush.msra.mxu0 %v124_v1  ;;  %v120_v8 = vld [vmem:[#allocation5 + $0x50] sm:$0xff]  ;;  %v163_v9 = vld [vmem:[#allocation7 + $0x60] sm:$0xff]  ;;  %v119_v10 = vld [vmem:[#allocation5 + $0x48] sm:$0xff] }
  0x1a   :  { %172 = vmatpush.msra.mxu1 %v165_v6  ;;  %v162_v11 = vld [vmem:[#allocation7 + $0x58] sm:$0xff]  ;;  %v118_v12 = vld [vmem:[#allocation5 + $0x40] sm:$0xff]  ;;  %v161_v13 = vld [vmem:[#allocation7 + $0x50] sm:$0xff] }
  0x1b   :  { %132 = vmatpush.msra.mxu0 %v123_v2  ;;  %v117_v14 = vld [vmem:[#allocation5 + $0x38] sm:$0xff]  ;;  %v160_v15 = vld [vmem:[#allocation7 + $0x48] sm:$0xff]  ;;  %v116_v16 = vld [vmem:[#allocation5 + $0x30] sm:$0xff] }
  0x1c   :  { %173 = vmatpush.msra.mxu1 %v164_v7  ;;  %v159_v17 = vld [vmem:[#allocation7 + $0x40] sm:$0xff]  ;;  %v115_v18 = vld [vmem:[#allocation5 + $0x28] sm:$0xff]  ;;  %v158_v19 = vld [vmem:[#allocation7 + $0x38] sm:$0xff] }
  0x1d   :  { %133 = vmatpush.msra.mxu0 %v122_v3  ;;  %v114_v20 = vld [vmem:[#allocation5 + $0x20] sm:$0xff]  ;;  %v157_v21 = vld [vmem:[#allocation7 + $0x30] sm:$0xff]  ;;  %v113_v22 = vld [vmem:[#allocation5 + $0x18] sm:$0xff] }
  0x1e   :  { %174 = vmatpush.msra.mxu1 %v163_v9  ;;  %v156_v23 = vld [vmem:[#allocation7 + $0x28] sm:$0xff]  ;;  %v112_v24 = vld [vmem:[#allocation5 + $0x10] sm:$0xff]  ;;  %v155_v25 = vld [vmem:[#allocation7 + $0x20] sm:$0xff] }
  0x1f   :  { %134 = vmatpush.msra.mxu0 %v121_v5  ;;  %v111_v26 = vld [vmem:[#allocation5 + $0x8] sm:$0xff]  ;;  %v154_v27 = vld [vmem:[#allocation7 + $0x18] sm:$0xff]  ;;  %v110_v28 = vld [vmem:[#allocation5] sm:$0xff] }
  0x20   :  { %175 = vmatpush.msra.mxu1 %v162_v11  ;;  %v109_v29 = vld [vmem:[#allocation2] sm:$0xff]  ;;  %v153_v30 = vld [vmem:[#allocation7 + $0x10] sm:$0xff]  ;;  %v152_v31 = vld [vmem:[#allocation7 + $0x8] sm:$0xff] }
  0x21   :  { %135 = vmatpush.msra.mxu0 %v120_v8  ;;  %v151_v32 = vld [vmem:[#allocation7] sm:$0xff]  ;;  %v207_v33 = vld [vmem:[#allocation8 + $0x78] sm:$0xff]  ;;  %v206_v34 = vld [vmem:[#allocation8 + $0x70] sm:$0xff] }
  0x22   :  { %176 = vmatpush.msra.mxu1 %v161_v13  ;;  %212 = vmatpush.msra.mxu2 %v207_v33  ;;  %v205_v35 = vld [vmem:[#allocation8 + $0x68] sm:$0xff]  ;;  %v204_v36 = vld [vmem:[#allocation8 + $0x60] sm:$0xff]  ;;  %v203_v37 = vld [vmem:[#allocation8 + $0x58] sm:$0xff] }
  0x23   :  { %136 = vmatpush.msra.mxu0 %v119_v10  ;;  %v202_v38 = vld [vmem:[#allocation8 + $0x50] sm:$0xff]  ;;  %v201_v39 = vld [vmem:[#allocation8 + $0x48] sm:$0xff]  ;;  %v200_v40 = vld [vmem:[#allocation8 + $0x40] sm:$0xff] }
  0x24   :  { %177 = vmatpush.msra.mxu1 %v160_v15  ;;  %213 = vmatpush.msra.mxu2 %v206_v34  ;;  %v199_v41 = vld [vmem:[#allocation8 + $0x38] sm:$0xff]  ;;  %v198_v42 = vld [vmem:[#allocation8 + $0x30] sm:$0xff]  ;;  %v197_v43 = vld [vmem:[#allocation8 + $0x28] sm:$0xff] }
  0x25   :  { %137 = vmatpush.msra.mxu0 %v118_v12  ;;  %v196_v44 = vld [vmem:[#allocation8 + $0x20] sm:$0xff]  ;;  %v195_v45 = vld [vmem:[#allocation8 + $0x18] sm:$0xff]  ;;  %v194_v50 = vld [vmem:[#allocation8 + $0x10] sm:$0xff] }
  0x26   :  { %178 = vmatpush.msra.mxu1 %v159_v17  ;;  %214 = vmatpush.msra.mxu2 %v205_v35  ;;  %v323_v46 = vld [vmem:[%s573_s2] ss:$0 sm:$0xff]  ;;  %v193_v51 = vld [vmem:[#allocation8 + $0x8] sm:$0xff]  ;;  %v192_v52 = vld [vmem:[#allocation8] sm:$0xff] }
  0x27   :  { %138 = vmatpush.msra.mxu0 %v117_v14  ;;  %v248_v53 = vld [vmem:[#allocation10 + $0x78] sm:$0xff]  ;;  %v247_v54 = vld [vmem:[#allocation10 + $0x70] sm:$0xff]  ;;  %v246_v55 = vld [vmem:[#allocation10 + $0x68] sm:$0xff] }
  0x28   :  { %179 = vmatpush.msra.mxu1 %v158_v19  ;;  %215 = vmatpush.msra.mxu2 %v204_v36  ;;  %v245_v56 = vld [vmem:[#allocation10 + $0x60] sm:$0xff]  ;;  %v244_v57 = vld [vmem:[#allocation10 + $0x58] sm:$0xff]  ;;  %v243_v58 = vld [vmem:[#allocation10 + $0x50] sm:$0xff] }
  0x29   :  { %139 = vmatpush.msra.mxu0 %v116_v16  ;;  %253 = vmatpush.msra.mxu3 %v248_v53  ;;  %v242_v59 = vld [vmem:[#allocation10 + $0x48] sm:$0xff]  ;;  %v241_v60 = vld [vmem:[#allocation10 + $0x40] sm:$0xff]  ;;  %v240_v61 = vld [vmem:[#allocation10 + $0x38] sm:$0xff] }
  0x2a   :  { %180 = vmatpush.msra.mxu1 %v157_v21  ;;  %216 = vmatpush.msra.mxu2 %v203_v37  ;;  %v239_v62 = vld [vmem:[#allocation10 + $0x30] sm:$0xff]  ;;  %v238_v63 = vld [vmem:[#allocation10 + $0x28] sm:$0xff]  ;;  %v237_v0 = vld [vmem:[#allocation10 + $0x20] sm:$0xff] }
  0x2b   :  { %140 = vmatpush.msra.mxu0 %v115_v18  ;;  %254 = vmatpush.msra.mxu3 %v247_v54  ;;  %v236_v1 = vld [vmem:[#allocation10 + $0x18] sm:$0xff]  ;;  %v235_v6 = vld [vmem:[#allocation10 + $0x10] sm:$0xff]  ;;  %v234_v7 = vld [vmem:[#allocation10 + $0x8] sm:$0xff] }
  0x2c   :  { %181 = vmatpush.msra.mxu1 %v156_v23  ;;  %217 = vmatpush.msra.mxu2 %v202_v38  ;;  %v324_v2 = vld [vmem:[%s575_s4] ss:$0 sm:$0xff]  ;;  %v233_v8 = vld [vmem:[#allocation10] sm:$0xff] }
  0x2d   :  { %141 = vmatpush.msra.mxu0 %v114_v20  ;;  %255 = vmatpush.msra.mxu3 %v246_v55  ;;  %v325_v9 = vld [vmem:[%s577_s6] ss:$0 sm:$0xff]  ;;  %s490_s6 = smov [#allocation11]  }
  0x2e   :  { %182 = vmatpush.msra.mxu1 %v155_v25  ;;  %218 = vmatpush.msra.mxu2 %v201_v39  ;;  %v326_v13 = vld [vmem:[%s579_s8] ss:$0 sm:$0xff]  ;;  %s301_s8 = sshll.u32 %s490_s6, 4  ;;  %s302_s8 = int_to_ptr.vmem [resolvable:$true] %s301_s8 }
  0x2f   :  { %142 = vmatpush.msra.mxu0 %v113_v22  ;;  %256 = vmatpush.msra.mxu3 %v245_v56 }
  0x30   :  { %183 = vmatpush.msra.mxu1 %v154_v27  ;;  %219 = vmatpush.msra.mxu2 %v200_v40 }
  0x31   :  { %143 = vmatpush.msra.mxu0 %v112_v24  ;;  %257 = vmatpush.msra.mxu3 %v244_v57 }
  0x32   :  { %184 = vmatpush.msra.mxu1 %v153_v30  ;;  %220 = vmatpush.msra.mxu2 %v199_v41 }
  0x33   :  { %144 = vmatpush.msra.mxu0 %v111_v26  ;;  %258 = vmatpush.msra.mxu3 %v243_v58 }
  0x34   :  { %185 = vmatpush.msra.mxu1 %v152_v31  ;;  %221 = vmatpush.msra.mxu2 %v198_v42 }
  0x35   :  { %145 = vmatpush.msra.mxu0 %v110_v28  ;;  %259 = vmatpush.msra.mxu3 %v242_v59 }
  0x36   :  { %146 = vmatmul.f32.vlgmr.msra.gmra.mxu0 %v109_v29  ;;  %186 = vmatpush.msra.mxu1 %v151_v32 }
  0x37   :  { %222 = vmatpush.msra.mxu2 %v197_v43  ;;  %260 = vmatpush.msra.mxu3 %v241_v60 }
  0x39   :  { %223 = vmatpush.msra.mxu2 %v196_v44  ;;  %261 = vmatpush.msra.mxu3 %v240_v61 }
  0x3b   :  { %224 = vmatpush.msra.mxu2 %v195_v45  ;;  %262 = vmatpush.msra.mxu3 %v239_v62 }
  0x3d   :  { %225 = vmatpush.msra.mxu2 %v194_v50  ;;  %263 = vmatpush.msra.mxu3 %v238_v63 }
  0x3f   :  { %226 = vmatpush.msra.mxu2 %v193_v51  ;;  %264 = vmatpush.msra.mxu3 %v237_v0 }
  0x41   :  { %227 = vmatpush.msra.mxu2 %v192_v52  ;;  %265 = vmatpush.msra.mxu3 %v236_v1 }
  0x43   :  { %266 = vmatpush.msra.mxu3 %v235_v6 }
  0x45   :  { %267 = vmatpush.msra.mxu3 %v234_v7 }
  0x47   :  { %268 = vmatpush.msra.mxu3 %v233_v8 }
  0xb3   :  { %v147_v47 = vpop.f32.mrf.mxu0 }
  0xb4   :  { %v148_v48 = vadd.f32 %v323_v46, %v147_v47 }
  0xb6   :  { %v150_v49 = vmax.f32 %v148_v48, 0.0 }
  0xb8   :  { %187 = vmatmul.f32.vlgmr.msra.gmra.mxu1 %v150_v49 }
 0x135   :  { %v188_v3 = vpop.f32.mrf.mxu1 }
 0x136   :  { %v189_v4 = vadd.f32 %v324_v2, %v188_v3 }
 0x138   :  { %v191_v5 = vmax.f32 %v189_v4, 0.0 }
 0x13a   :  { %228 = vmatmul.f32.vlgmr.msra.gmra.mxu2 %v191_v5 }
 0x1bd   :  { %v229_v10 = vpop.f32.mrf.mxu2 }
 0x1be   :  { %v230_v11 = vadd.f32 %v325_v9, %v229_v10 }
 0x1c0   :  { %v232_v12 = vmax.f32 %v230_v11, 0.0 }
 0x1c2   :  { %269 = vmatmul.f32.vlgmr.msra.gmra.mxu3 %v232_v12 }
 0x245   :  { %v270_v14 = vpop.f32.mrf.mxu3 }
 0x246   :  { %v271_v15 = vadd.f32 %v326_v13, %v270_v14 }
 0x248   :  { %273 = vmax.xlane.f32.xlu0 %v271_v15 }
 0x2bb   :  { %v274_v16 = vpop.xlane.xlu0 %273 }
 0x2bc   :  { %v275_v17 = vsub.f32 %v271_v15, %v274_v16 }
 0x2be   :  { %v276_v18 = vmul.f32 1.442695, %v275_v17 }
 0x2c0   :  { %327 = vpow2.f32 %v276_v18 }
 0x2c6   :  { %v328_v19 = vpop.eup %327 }
 0x2c7   :  { %278 = vadd.xlane.f32.xlu0 %v328_v19 }
 0x33a   :  { %v279_v20 = vpop.xlane.xlu0 %278 }
 0x33b   :  { %329 = vrcp.f32 %v279_v20  ;;  %v291_v24 = vand.u32 2147483648, %v279_v20  ;;  %v289_v26 = vand.u32 2147483647, %v279_v20  ;;  %vm285_vm1 = vweird.f32 %v279_v20 }
 0x33d   :  { %v292_v28 = vor.u32 1.1754944e-38, %v291_v24  ;;  %vm290_vm3 = vcmp.eq.f32.partialorder %v289_v26, 8.507059e+37 }
 0x341   :  { %v330_v21 = vpop.eup %329 }
 0x342   :  { %v281_v22 = vmul.f32 %v330_v21, %v279_v20  ;;  %vm286_vm0 = vweird.f32 %v330_v21 }
 0x343   :  { %vm287_vm2 = vmor %vm285_vm1, %vm286_vm0 }
 0x344   :  { %v282_v23 = vsub.f32 1.0, %v281_v22 }
 0x346   :  { %v283_v25 = vmul.f32 %v330_v21, %v282_v23 }
 0x348   :  { %v284_v27 = vadd.f32 %v330_v21, %v283_v25 }
 0x34a   :  { %v288_v29 = vsel %vm287_vm2, %v330_v21, %v284_v27 }
 0x34b   :  { %v293_v30 = vsel %vm290_vm3, %v292_v28, %v288_v29 }
 0x34c   :  { %v294_v31 = vmul.f32 %v328_v19, %v293_v30 }
 0x34e   :  { %295 = vst [vmem:[#allocation11] sm:$0xff] %v294_v31 }
 0x34f   :  { %306 = dma.vmem_to_hbm [thread:$0]  %s302_s8, 128, %s304_s18, [#allocation4]  }
 0x350   :  { %481 = dma.done.wait [#allocation4], 128  }
 0x351   :  { %482 = vsyncadd [#allocation4], 4294967168 }
 0x352   :  { %311 = vsyncpa [#allocation3], 1 }
 0x353   :  { %312 = vsyncpa [#allocation6], 1 }
 0x354   :  { %313 = vsyncpa [#allocation9], 1 }
 0x355   :  { %314 = vsyncpa [#allocation4], 1 }

</bundles_post_ra>
